<compile_context>
chip_gen: v6e
topology: v6e:2x2x1
jax: 0.10.0
libtpu: 0.0.40
codegen_flags: <defaults>
</compile_context>

<pallas_src>
import functools

import jax
import jax.numpy as jnp
import numpy as np
from jax.experimental import pallas as pl
from jax.experimental.pallas import tpu as pltpu


def _mah_kernel(Bt, S, D,
                x_ref, bias_ref, vpe_ref, wv_ref, wkq_ref, gamma_ref, beta_ref,
                out_ref):
    # ---- projections: run all Bt*S rows through the MXU at once (bf16 in, f32 acc) ----
    x = x_ref[...].reshape(Bt * S, D).astype(jnp.bfloat16)          # (Bt*S, D)
    v = jnp.dot(x, wv_ref[...], preferred_element_type=jnp.float32)  # (Bt*S, D) f32

    # One matmul produces [k | q/sqrt(D)]  (wkq = [Wk^T | Wq^T/sqrt(D)], bf16).
    kq = jnp.dot(v.astype(jnp.bfloat16), wkq_ref[...],
                 preferred_element_type=jnp.float32)                  # (Bt*S, 2D) f32
    k = kq[:, :D].reshape(Bt, S, D)
    q = kq[:, D:].reshape(Bt, S, D)                                   # already scaled

    # ---- energy + additive bias (bias = kpe_sum/sqrt(D) + (-inf where mask==0)) ----
    energy = jnp.einsum("bqd,bkd->bqk",
                        q.astype(jnp.bfloat16), k.astype(jnp.bfloat16),
                        preferred_element_type=jnp.float32)           # (Bt, S, S)
    logits = energy + bias_ref[...]

    # ---- softmax over keys ----
    m = jnp.max(logits, axis=-1, keepdims=True)
    p = jnp.exp(logits - m)
    l = jnp.sum(p, axis=-1, keepdims=True)
    attn = p * pl.reciprocal(l, approx=True)                          # (Bt, S, S)

    # ---- quirky PyTorch broadcast: out = v * sum_j attn + vpe.sum(-2) ----
    attn_rowsum = jnp.sum(attn, axis=-1, keepdims=True)               # (Bt, S, 1)  (~1)
    v3 = v.reshape(Bt, S, D)
    out = v3 * attn_rowsum + vpe_ref[...]                             # (Bt, S, D)

    # ---- LayerNorm over the last dim (eps = 1e-5) ----
    mu = jnp.mean(out, axis=-1, keepdims=True)
    var = jnp.mean((out - mu) ** 2, axis=-1, keepdims=True)
    normed = (out - mu) * jax.lax.rsqrt(var + 1e-5)
    normed = normed * gamma_ref[...] + beta_ref[...]

    res = normed + v3                                                 # (Bt, S, D)

    # ---- lane-packed store: (S, Bt*D), unpacked in the wrapper ----
    if Bt == 1:
        packed = res[0]
    else:
        packed = jnp.concatenate([res[b] for b in range(Bt)], axis=-1)
    out_ref[0] = packed.astype(out_ref.dtype)


def masked_attention_head(values, keys, queries, mask,
                          values_pos_enc, keys_pos_enc,
                          wv, wk, wq, gamma, beta, *, batch_block=None):
    """Pallas wrapper.  `keys` / `queries` are accepted but unused, exactly like the
    PyTorch forward (which re-projects the projected values)."""
    del keys, queries  # unused by the reference forward pass
    B, S, D = values.shape
    scale = 1.0 / (D ** 0.5)

    # Pick how many batch elements each grid step processes.  Keep >= 2 grid steps
    # when B >= 2 so both v7x TensorCores get work; stack batches otherwise so the
    # tiny (S, D) matmuls fill more MXU rows.
    if batch_block is None:
        batch_block = 1
        limit = max(1, min(B // 2, 8))
        for cand in range(limit, 0, -1):
            if B % cand == 0:
                batch_block = cand
                break
    assert B % batch_block == 0, "batch_block must divide batch size"
    Bt = batch_block
    nb = B // Bt

    # ---- batch-invariant / loop-invariant precomputation (hoisted out of the kernel) ----
    kpe_sum = keys_pos_enc.sum(axis=-1).astype(jnp.float32)            # (S, S)
    vpe_sum = values_pos_enc.sum(axis=-2).astype(jnp.float32)          # (S, D)
    # Additive mask bias; -inf keeps the exact masked_fill(-inf) semantics (fully
    # masked rows produce NaN, as in PyTorch).  Use -1e30 here if finite outputs are
    # required for fully-masked rows.
    neg = jnp.where(mask == 0, -jnp.inf, 0.0).astype(jnp.float32)      # (B, S, S)
    bias = kpe_sum[None] * scale + neg                                  # (B, S, S)

    wv_t = wv.T.astype(jnp.bfloat16)                                    # (D, D)
    wkq_t = jnp.concatenate([wk.T, wq.T * scale], axis=1).astype(jnp.bfloat16)  # (D, 2D)
    gamma2d = gamma.reshape(1, D).astype(jnp.float32)
    beta2d = beta.reshape(1, D).astype(jnp.float32)

    kernel = functools.partial(_mah_kernel, Bt, S, D)

    packed = pl.pallas_call(
        kernel,
        out_shape=jax.ShapeDtypeStruct((nb, S, Bt * D), values.dtype),
        grid_spec=pltpu.PrefetchScalarGridSpec(
            num_scalar_prefetch=0,
            grid=(nb,),
            in_specs=[
                pl.BlockSpec((Bt, S, D), lambda g: (g, 0, 0)),   # values block
                pl.BlockSpec((Bt, S, S), lambda g: (g, 0, 0)),   # additive bias block
                pl.BlockSpec((S, D), lambda g: (0, 0)),          # vpe.sum(-2)
                pl.BlockSpec((D, D), lambda g: (0, 0)),          # Wv^T (bf16)
                pl.BlockSpec((D, 2 * D), lambda g: (0, 0)),      # [Wk^T | Wq^T/sqrt(D)] (bf16)
                pl.BlockSpec((1, D), lambda g: (0, 0)),          # layernorm gamma
                pl.BlockSpec((1, D), lambda g: (0, 0)),          # layernorm beta
            ],
            out_specs=pl.BlockSpec((1, S, Bt * D), lambda g: (g, 0, 0)),
        ),
        compiler_params=pltpu.CompilerParams(
            dimension_semantics=("parallel",),
            vmem_limit_bytes=32 * 1024 * 1024),
    )(values, bias, vpe_sum, wv_t, wkq_t, gamma2d, beta2d)

    # Unpack (nb, S, Bt*D) -> (B, S, D).
    out = packed.reshape(nb, S, Bt, D).transpose(0, 2, 1, 3).reshape(B, S, D)
    return out


def _reference(values, keys, queries, mask, values_pos_enc, keys_pos_enc,
               wv, wk, wq, gamma, beta):
    """Pure-JAX line-by-line mirror of the PyTorch forward (incl. its broadcasting)."""
    del keys, queries
    head_dim = values.shape[-1]
    v = values @ wv.T
    k = v @ wk.T
    q = v @ wq.T
    unreduced_energy = q[..., None, :] * k[..., None, :, :] + keys_pos_enc
    energy = unreduced_energy.sum(-1)
    energy = jnp.where(mask == 0, -jnp.inf, energy)
    attn = jax.nn.softmax(energy / head_dim ** 0.5, axis=-1)
    unreduced_out = attn[..., None] * v[..., None, :] + values_pos_enc
    out = unreduced_out.sum(-2)
    mu = out.mean(-1, keepdims=True)
    var = ((out - mu) ** 2).mean(-1, keepdims=True)
    normed = (out - mu) / jnp.sqrt(var + 1e-5) * gamma + beta
    return normed + v


if __name__ == "__main__":
    B, S, D = 2, 8, 32  # batch, seq, head_dim

    key = jax.random.PRNGKey(0)
    k_v, k_k, k_q, k_wv, k_wk, k_wq, k_kpe, k_vpe = jax.random.split(key, 8)

    values = jax.random.normal(k_v, (B, S, D), dtype=jnp.float32)
    keys_in = jax.random.normal(k_k, (B, S, D), dtype=jnp.float32)     # unused by forward
    queries_in = jax.random.normal(k_q, (B, S, D), dtype=jnp.float32)  # unused by forward

    # Causal mask (guarantees >= 1 unmasked key per query row).
    mask = jnp.tril(jnp.ones((S, S), dtype=jnp.int32))[None].repeat(B, axis=0)

    keys_pos_enc = 0.1 * jax.random.normal(k_kpe, (S, S, D), dtype=jnp.float32)
    values_pos_enc = 0.1 * jax.random.normal(k_vpe, (S, S, D), dtype=jnp.float32)

    # Deterministic parameter init (nn.Linear-style uniform, LayerNorm defaults).
    bound = 1.0 / np.sqrt(D)
    wv = jax.random.uniform(k_wv, (D, D), jnp.float32, -bound, bound)
    wk = jax.random.uniform(k_wk, (D, D), jnp.float32, -bound, bound)
    wq = jax.random.uniform(k_wq, (D, D), jnp.float32, -bound, bound)
    gamma = jnp.ones((D,), jnp.float32)
    beta = jnp.zeros((D,), jnp.float32)

    out = masked_attention_head(values, keys_in, queries_in, mask,
                                values_pos_enc, keys_pos_enc,
                                wv, wk, wq, gamma, beta)
    out = jax.block_until_ready(out)

    ref = _reference(values, keys_in, queries_in, mask,
                     values_pos_enc, keys_pos_enc,
                     wv, wk, wq, gamma, beta)
    # bf16 MXU operands (f32 accumulation) vs f32 reference -> relaxed tolerance.
    np.testing.assert_allclose(np.asarray(out), np.asarray(ref), rtol=2e-2, atol=2e-2)

    print("KERNEL_OK")
</pallas_src>

<mosaic_0001>
module attributes {stable_mosaic.version = 11 : i64} {
  func.func @_mah_kernel(%arg0: i32, %arg1: memref<1x8x32xf32, #tpu.memory_space<vmem>>, %arg2: memref<1x8x8xf32, #tpu.memory_space<vmem>>, %arg3: memref<8x32xf32, #tpu.memory_space<vmem>>, %arg4: memref<32x32xbf16, #tpu.memory_space<vmem>>, %arg5: memref<32x64xbf16, #tpu.memory_space<vmem>>, %arg6: memref<1x32xf32, #tpu.memory_space<vmem>>, %arg7: memref<1x32xf32, #tpu.memory_space<vmem>>, %arg8: memref<1x8x32xf32, #tpu.memory_space<vmem>>) attributes {dimension_semantics = [#tpu.dimension_semantics<parallel>], iteration_bounds = array<i64: 2>, scalar_prefetch = 0 : i64, scratch_operands = 0 : i64, tpu.core_type = #tpu.core_type<tc>, window_params = [{transform_indices = @transform_0, window_bounds = array<i64: 1, 8, 32>}, {transform_indices = @transform_1, window_bounds = array<i64: 1, 8, 8>}, {pipeline_mode = #tpu.pipeline_mode<synchronous>, transform_indices = @transform_2, window_bounds = array<i64: 8, 32>}, {pipeline_mode = #tpu.pipeline_mode<synchronous>, transform_indices = @transform_3, window_bounds = array<i64: 32, 32>}, {pipeline_mode = #tpu.pipeline_mode<synchronous>, transform_indices = @transform_4, window_bounds = array<i64: 32, 64>}, {pipeline_mode = #tpu.pipeline_mode<synchronous>, transform_indices = @transform_5, window_bounds = array<i64: 1, 32>}, {pipeline_mode = #tpu.pipeline_mode<synchronous>, transform_indices = @transform_6, window_bounds = array<i64: 1, 32>}, {transform_indices = @transform_7, window_bounds = array<i64: 1, 8, 32>}]} {
    %c0 = arith.constant 0 : index
    %c0_0 = arith.constant 0 : index
    %c0_1 = arith.constant 0 : index
    %0 = vector.load %arg1[%c0, %c0_0, %c0_1] : memref<1x8x32xf32, #tpu.memory_space<vmem>>, vector<1x8x32xf32>
    %1 = vector.shape_cast %0 : vector<1x8x32xf32> to vector<8x32xf32>
    %2 = arith.truncf %1 : vector<8x32xf32> to vector<8x32xbf16>
    %c0_2 = arith.constant 0 : index
    %c0_3 = arith.constant 0 : index
    %3 = vector.load %arg4[%c0_2, %c0_3] : memref<32x32xbf16, #tpu.memory_space<vmem>>, vector<32x32xbf16>
    %cst = arith.constant dense<0.000000e+00> : vector<8x32xf32>
    %4 = tpu.matmul %2, %3, %cst {dimension_numbers = #tpu.dot_dimension_numbers<[1], [0], [0], [1], [0, 0, 1, 1], [], []>} : vector<8x32xbf16>, vector<32x32xbf16>, vector<8x32xf32> -> vector<8x32xf32>
    %5 = arith.truncf %4 : vector<8x32xf32> to vector<8x32xbf16>
    %c0_4 = arith.constant 0 : index
    %c0_5 = arith.constant 0 : index
    %6 = vector.load %arg5[%c0_4, %c0_5] : memref<32x64xbf16, #tpu.memory_space<vmem>>, vector<32x64xbf16>
    %cst_6 = arith.constant dense<0.000000e+00> : vector<8x64xf32>
    %7 = tpu.matmul %5, %6, %cst_6 {dimension_numbers = #tpu.dot_dimension_numbers<[1], [0], [0], [1], [0, 0, 1, 1], [], []>} : vector<8x32xbf16>, vector<32x64xbf16>, vector<8x64xf32> -> vector<8x64xf32>
    %8 = vector.extract_strided_slice %7 {offsets = [0, 0], sizes = [8, 32], strides = [1, 1]} : vector<8x64xf32> to vector<8x32xf32>
    %9 = vector.shape_cast %8 : vector<8x32xf32> to vector<1x8x32xf32>
    %10 = vector.extract_strided_slice %7 {offsets = [0, 32], sizes = [8, 32], strides = [1, 1]} : vector<8x64xf32> to vector<8x32xf32>
    %11 = vector.shape_cast %10 : vector<8x32xf32> to vector<1x8x32xf32>
    %12 = arith.truncf %11 : vector<1x8x32xf32> to vector<1x8x32xbf16>
    %13 = arith.truncf %9 : vector<1x8x32xf32> to vector<1x8x32xbf16>
    "tpu.trace_start"() <{level = 10 : i32, message = "bqd,bkd->bqk"}> : () -> ()
    %cst_7 = arith.constant dense<0.000000e+00> : vector<1x8x8xf32>
    %14 = tpu.matmul %12, %13, %cst_7 {dimension_numbers = #tpu.dot_dimension_numbers<[2], [2], [1], [1], [0, 0, 0, 1, 1, 1], [0], [0]>} : vector<1x8x32xbf16>, vector<1x8x32xbf16>, vector<1x8x8xf32> -> vector<1x8x8xf32>
    "tpu.trace_stop"() : () -> ()
    %c0_8 = arith.constant 0 : index
    %c0_9 = arith.constant 0 : index
    %c0_10 = arith.constant 0 : index
    %15 = vector.load %arg2[%c0_8, %c0_9, %c0_10] : memref<1x8x8xf32, #tpu.memory_space<vmem>>, vector<1x8x8xf32>
    %16 = arith.addf %14, %15 : vector<1x8x8xf32>
    %cst_11 = arith.constant dense<0xFF800000> : vector<1x8xf32>
    %17 = vector.multi_reduction <maximumf>, %16, %cst_11 [2] : vector<1x8x8xf32> to vector<1x8xf32>
    %18 = vector.shape_cast %17 : vector<1x8xf32> to vector<1x8x1xf32>
    %19 = vector.broadcast %18 : vector<1x8x1xf32> to vector<1x8x8xf32>
    %20 = arith.subf %16, %19 : vector<1x8x8xf32>
    %21 = math.exp %20 : vector<1x8x8xf32>
    %cst_12 = arith.constant dense<0.000000e+00> : vector<1x8xf32>
    %22 = vector.multi_reduction <add>, %21, %cst_12 [2] : vector<1x8x8xf32> to vector<1x8xf32>
    %23 = vector.shape_cast %22 : vector<1x8xf32> to vector<1x8x1xf32>
    %24 = tpu.reciprocal %23 {approx = true} : vector<1x8x1xf32> -> vector<1x8x1xf32>
    %25 = vector.broadcast %24 : vector<1x8x1xf32> to vector<1x8x8xf32>
    %26 = arith.mulf %21, %25 : vector<1x8x8xf32>
    %cst_13 = arith.constant dense<0.000000e+00> : vector<1x8xf32>
    %27 = vector.multi_reduction <add>, %26, %cst_13 [2] : vector<1x8x8xf32> to vector<1x8xf32>
    %28 = vector.shape_cast %27 : vector<1x8xf32> to vector<1x8x1xf32>
    %29 = vector.shape_cast %4 : vector<8x32xf32> to vector<1x8x32xf32>
    %30 = vector.broadcast %28 : vector<1x8x1xf32> to vector<1x8x32xf32>
    %31 = arith.mulf %29, %30 : vector<1x8x32xf32>
    %c0_14 = arith.constant 0 : index
    %c0_15 = arith.constant 0 : index
    %32 = vector.load %arg3[%c0_14, %c0_15] : memref<8x32xf32, #tpu.memory_space<vmem>>, vector<8x32xf32>
    %33 = vector.shape_cast %32 : vector<8x32xf32> to vector<1x8x32xf32>
    %34 = arith.addf %31, %33 : vector<1x8x32xf32>
    %cst_16 = arith.constant dense<0.000000e+00> : vector<1x8xf32>
    %35 = vector.multi_reduction <add>, %34, %cst_16 [2] : vector<1x8x32xf32> to vector<1x8xf32>
    %36 = vector.shape_cast %35 : vector<1x8xf32> to vector<1x8x1xf32>
    %cst_17 = arith.constant 3.200000e+01 : f32
    %37 = vector.broadcast %cst_17 : f32 to vector<1x8x1xf32>
    %38 = arith.divf %36, %37 : vector<1x8x1xf32>
    %39 = vector.broadcast %38 : vector<1x8x1xf32> to vector<1x8x32xf32>
    %40 = arith.subf %34, %39 : vector<1x8x32xf32>
    %41 = arith.mulf %40, %40 : vector<1x8x32xf32>
    %cst_18 = arith.constant dense<0.000000e+00> : vector<1x8xf32>
    %42 = vector.multi_reduction <add>, %41, %cst_18 [2] : vector<1x8x32xf32> to vector<1x8xf32>
    %43 = vector.shape_cast %42 : vector<1x8xf32> to vector<1x8x1xf32>
    %cst_19 = arith.constant 3.200000e+01 : f32
    %44 = vector.broadcast %cst_19 : f32 to vector<1x8x1xf32>
    %45 = arith.divf %43, %44 : vector<1x8x1xf32>
    %46 = vector.broadcast %38 : vector<1x8x1xf32> to vector<1x8x32xf32>
    %47 = arith.subf %34, %46 : vector<1x8x32xf32>
    %cst_20 = arith.constant 9.99999974E-6 : f32
    %48 = vector.broadcast %cst_20 : f32 to vector<1x8x1xf32>
    %49 = arith.addf %45, %48 : vector<1x8x1xf32>
    %50 = math.rsqrt %49 : vector<1x8x1xf32>
    %51 = vector.broadcast %50 : vector<1x8x1xf32> to vector<1x8x32xf32>
    %52 = arith.mulf %47, %51 : vector<1x8x32xf32>
    %c0_21 = arith.constant 0 : index
    %c0_22 = arith.constant 0 : index
    %53 = vector.load %arg6[%c0_21, %c0_22] : memref<1x32xf32, #tpu.memory_space<vmem>>, vector<1x32xf32>
    %54 = vector.shape_cast %53 : vector<1x32xf32> to vector<1x1x32xf32>
    %55 = vector.broadcast %54 : vector<1x1x32xf32> to vector<1x8x32xf32>
    %56 = arith.mulf %52, %55 : vector<1x8x32xf32>
    %c0_23 = arith.constant 0 : index
    %c0_24 = arith.constant 0 : index
    %57 = vector.load %arg7[%c0_23, %c0_24] : memref<1x32xf32, #tpu.memory_space<vmem>>, vector<1x32xf32>
    %58 = vector.shape_cast %57 : vector<1x32xf32> to vector<1x1x32xf32>
    %59 = vector.broadcast %58 : vector<1x1x32xf32> to vector<1x8x32xf32>
    %60 = arith.addf %56, %59 : vector<1x8x32xf32>
    %61 = arith.addf %60, %29 : vector<1x8x32xf32>
    %62 = vector.shape_cast %61 : vector<1x8x32xf32> to vector<8x32xf32>
    %c0_25 = arith.constant 0 : index
    %c0_26 = arith.constant 0 : index
    %c0_27 = arith.constant 0 : index
    %63 = vector.load %arg8[%c0_25, %c0_26, %c0_27] : memref<1x8x32xf32, #tpu.memory_space<vmem>>, vector<1x8x32xf32>
    %64 = vector.shape_cast %63 : vector<1x8x32xf32> to vector<8x32xf32>
    %65 = vector.shape_cast %62 : vector<8x32xf32> to vector<1x8x32xf32>
    tpu.vector_store %arg8[%c0_25, %c0_26, %c0_27], %65 {strides = array<i32>} : memref<1x8x32xf32, #tpu.memory_space<vmem>>, vector<1x8x32xf32>,
    return
  }
  func.func @transform_0(%arg0: i32) -> (i32, i32, i32) {
    %c0_i32 = arith.constant 0 : i32
    %c0_i32_0 = arith.constant 0 : i32
    %c0_i32_1 = arith.constant 0 : i32
    return %arg0, %c0_i32, %c0_i32_0 : i32, i32, i32
  }
  func.func @transform_1(%arg0: i32) -> (i32, i32, i32) {
    %c0_i32 = arith.constant 0 : i32
    %c0_i32_0 = arith.constant 0 : i32
    %c0_i32_1 = arith.constant 0 : i32
    return %arg0, %c0_i32, %c0_i32_0 : i32, i32, i32
  }
  func.func @transform_2(%arg0: i32) -> (i32, i32) {
    %c0_i32 = arith.constant 0 : i32
    %c0_i32_0 = arith.constant 0 : i32
    %c0_i32_1 = arith.constant 0 : i32
    return %c0_i32, %c0_i32_0 : i32, i32
  }
  func.func @transform_3(%arg0: i32) -> (i32, i32) {
    %c0_i32 = arith.constant 0 : i32
    %c0_i32_0 = arith.constant 0 : i32
    %c0_i32_1 = arith.constant 0 : i32
    return %c0_i32, %c0_i32_0 : i32, i32
  }
  func.func @transform_4(%arg0: i32) -> (i32, i32) {
    %c0_i32 = arith.constant 0 : i32
    %c0_i32_0 = arith.constant 0 : i32
    %c0_i32_1 = arith.constant 0 : i32
    return %c0_i32, %c0_i32_0 : i32, i32
  }
  func.func @transform_5(%arg0: i32) -> (i32, i32) {
    %c0_i32 = arith.constant 0 : i32
    %c0_i32_0 = arith.constant 0 : i32
    %c0_i32_1 = arith.constant 0 : i32
    return %c0_i32, %c0_i32_0 : i32, i32
  }
  func.func @transform_6(%arg0: i32) -> (i32, i32) {
    %c0_i32 = arith.constant 0 : i32
    %c0_i32_0 = arith.constant 0 : i32
    %c0_i32_1 = arith.constant 0 : i32
    return %c0_i32, %c0_i32_0 : i32, i32
  }
  func.func @transform_7(%arg0: i32) -> (i32, i32, i32) {
    %c0_i32 = arith.constant 0 : i32
    %c0_i32_0 = arith.constant 0 : i32
    %c0_i32_1 = arith.constant 0 : i32
    return %arg0, %c0_i32, %c0_i32_0 : i32, i32, i32
  }
}

</mosaic_0001>

<bundles_post_ra>
// kernel: tpu_custom_call.1
= control target key start
LH: loop header
LB: loop body
LE: loop exit
PB: predicated region body
PF: predicated region fallthrough
CT: control target
= control target key end

     0   :  { %s1399_s0 = inlined_call_operand.hbm [shape: f32[2,8,32], index: 0, kind: input, shape index: {}]   ;;  %s1400_s1 = inlined_call_operand.hbm [shape: f32[2,8,8], index: 1, kind: input, shape index: {}]   ;;  %s1401_s2 = inlined_call_operand.hbm [shape: f32[8,32], index: 2, kind: input, shape index: {}]   ;;  %s1402_s3 = inlined_call_operand.hbm [shape: bf16[32,32], index: 3, kind: input, shape index: {}]   ;;  %s1403_s4 = inlined_call_operand.hbm [shape: bf16[32,64], index: 4, kind: input, shape index: {}]   ;;  %s1404_s5 = inlined_call_operand.vmem [shape: f32[1,32], index: 5, kind: input, shape index: {}]   ;;  %s1405_s6 = inlined_call_operand.vmem [shape: f32[1,32], index: 6, kind: input, shape index: {}]   ;;  %s1406_s7 = inlined_call_operand.hbm [shape: f32[2,8,32], index: 7, kind: output, shape index: {}]  }
   0x1   :  { %1411 = sst [smem:[#allocation18_spill]] %s1401_s2 }
   0x2   :  { %1412 = sst [smem:[#allocation19_spill]] %s1402_s3 }
   0x3   :  { %1413 = sst [smem:[#allocation20_spill]] %s1403_s4 }
   0x4   :  { %12 = vsyncpa [#allocation3], 0 }
   0x5   :  { %14 = vsyncpa [#allocation3 + $0x1], 0 }
   0x6   :  { %15 = vsyncpa [#allocation6], 0 }
   0x7   :  { %17 = vsyncpa [#allocation6 + $0x1], 0 }
   0x8   :  { %18 = vsyncpa [#allocation9], 0 }
   0x9   :  { %19 = vsyncpa [#allocation4], 0 }
   0xa   :  { %21 = vsyncpa [#allocation4 + $0x1], 0  ;;  %s1151_s24 = smov 0   ;;  %s1153_s25 = smov 0  }
   0xb   :  { %s1155_s26 = smov 0   ;;  %s1157_s27 = smov 0  }
   0xc LB: > { %s1172_s28 = sadd.s32 4294967295, %s1098_s27   ;;  %s731_s29 = sadd.s32 4294967294, %s1098_s27   ;;  %s1098_s27 = sphi %s1157_s27, %s1438_s27   ;;  %s1094_s26 = sphi %s1155_s26, %s1437_s26   ;;  %s1090_s25 = sphi %s1153_s25, %s1436_s25   ;;  %s1086_s24 = sphi %s1151_s24, %s1435_s24  }
   0xd   : > { %p47_p0 = scmp.ne.s32.totalorder %s1090_s25, %s1086_s24  ;;  %p1407_p1 = scmp.eq.s32.totalorder %s1172_s28, 0 }
   0xe   : > { %p208_p3 = scmp.eq.s32.totalorder %s731_s29, 1  ;;  %p732_p5 = scmp.ge.s32.totalorder %s1098_s27, 1 }
   0xf   : > { %p1181_p4 = por %p1407_p1, %p47_p0  ;;  %p215_p7 = scmp.lt.s32.totalorder %s1098_s27, 3 }
  0x10   : > { %p1186_p6 = por %p208_p3, %p47_p0  ;;  %s1100_s10 = smov [#allocation7]  }
  0x11   : > { %s1414_s30 = scalar_select %p1181_p4, 1, 0 }
  0x12   : > { %s1415_s8 = scalar_select %p1186_p6, 1, 0 }
  0x13   : > { %p1191_p8 = pnand %p732_p5, %p215_p7  ;;  %s228_s11 = sshll.u32 %s1100_s10, 4  ;;  %s229_s11 = int_to_ptr.vmem [resolvable:$true] %s228_s11 }
  0x14   : > { %s1101_s12 = smov [#allocation8]   ;;  %s1102_s15 = smov [#allocation10]  }
  0x15   : > { %s1416_s9 = scalar_select %p1191_p8, 1, 0 }
  0x16   : > { %p809_p10 = pneg %p1191_p8  ;;  %s238_s13 = sshll.u32 %s1101_s12, 4  ;;  %s239_s13 = int_to_ptr.vmem [resolvable:$true] %s238_s13 }
  0x17   : > { %s251_s16 = sshll.u32 %s1102_s15, 4  ;;  %s899_s17 = scalar_lea.vmem %s229_s11, 128  ;;  %s252_s16 = int_to_ptr.vmem [resolvable:$true] %s251_s16 }
  0x18   : > { %p1200_p11 = pnand %p809_p10, %p1407_p1  ;;  %p900_p13 = scmp.ne.s32.totalorder %s229_s11, %s899_s17 }
  0x19   : > { %p907_p5 = scmp.lt.s32.totalorder %s229_s11, %s229_s11  ;;  %p908_p7 = scmp.lt.s32.totalorder %s899_s17, %s899_s17 }
  0x1a   : > { %p890_p12 = pneg %p1200_p11 }
  0x1b   : > { %p909_p9 = por %p908_p7, %p907_p5 }
  0x1c   : > { %p902_p0 = pnand %p900_p13, %p890_p12 }
  0x1e   : > { %p903_p3 = pneg %p902_p0 }
  0x20   : > { %p910_p10 = pnand %p909_p9, %p903_p3 }
  0x22   : > { %913 = shalt.err (!%p910_p10)
}
  0x23   : > { %s1418_s2 = sld [smem:[#allocation18_spill]]  ;;  %s925_s20 = scalar_lea.vmem %s239_s13, 256 }
  0x24   : > { %p926_p1 = scmp.ne.s32.totalorder %s239_s13, %s925_s20  ;;  %p933_p13 = scmp.lt.s32.totalorder %s239_s13, %s239_s13 }
  0x25   : > { %p934_p0 = scmp.lt.s32.totalorder %s925_s20, %s925_s20 }
  0x26   : > { %p928_p2 = pnand %p926_p1, %p890_p12 }
  0x27   : > { %p935_p4 = por %p934_p0, %p933_p13 }
  0x28   : > { %p929_p6 = pneg %p928_p2 }
  0x29   : > { %812 = dma.hbm_to_vmem [thread:$0]  (!%p1200_p11), %s1418_s2, 128, %s229_s11, [#allocation6]  }
  0x2a   : > { %p936_p8 = pnand %p935_p4, %p929_p6 }
  0x2c   : > { %939 = shalt.err (!%p936_p8)
}
  0x2d   : > { %s1103_s21 = smov 64   ;;  %s1104_s22 = smov 4  }
  0x2e   : > { %s1419_s3 = sld [smem:[#allocation19_spill]]  ;;  %s951_s10 = scalar_lea.vmem %s252_s16, 256 }
  0x2f   : > { %p952_p9 = scmp.ne.s32.totalorder %s252_s16, %s951_s10  ;;  %p959_p3 = scmp.lt.s32.totalorder %s252_s16, %s252_s16 }
  0x30   : > { %p960_p5 = scmp.lt.s32.totalorder %s951_s10, %s951_s10 }
  0x31   : > { %p954_p1 = pnand %p952_p9, %p890_p12 }
  0x32   : > { %p961_p4 = por %p960_p5, %p959_p3 }
  0x33   : > { %p955_p2 = pneg %p954_p1 }
  0x34   : > { %815 = dma.hbm_to_vmem [thread:$0]  (!%p1200_p11), %s1419_s3, 256, %s239_s13, [#allocation9], %s1103_s21, %s1103_s21, %s1104_s22  }
  0x35   : > { %p962_p6 = pnand %p961_p4, %p955_p2 }
  0x37   : > { %965 = shalt.err (!%p962_p6)
}
  0x38   : > { %s1420_s4 = sld [smem:[#allocation20_spill]]  ;;  %s1231_s13 = sadd.s32 1, %s1098_s27  }
  0x39   : > { %s31_s15 = ssub.s32 %s1098_s27, %s1231_s13  ;;  %s34_s14 = sadd.s32 1, %s1094_s26 }
  0x3a   : > { %p32_p8 = scmp.eq.s32.totalorder %s31_s15, 0  ;;  %p41_p12 = scmp.ne.s32.totalorder %s1094_s26, %s1090_s25 }
  0x3b   : > { %p42_p7 = scmp.eq.s32.totalorder %s1098_s27, 0  ;;  %p833_p10 = scmp.lt.s32.totalorder %s1098_s27, 2 }
  0x3c   : > { %s1241_s17 = scalar_select %p32_p8, %s1094_s26, %s34_s14  }
  0x3d   : > { %p43_p13 = por %p42_p7, %p41_p12  ;;  %p1422_p0 = scmp.eq.s32.totalorder %s1172_s28, 1 }
  0x3e   : > { %818 = dma.hbm_to_vmem [thread:$0]  (!%p1200_p11), %s1420_s4, 256, %s252_s16, [#allocation9], %s1103_s21, %s1103_s21, %s1104_s22  }
  0x3f   : > { %1421 = sst [smem:[#allocation17_spill]] %s1241_s17  ;;  %p1245_p9 = por %p1422_p0, %p41_p12 }
  0x40   : > { %s271_s19 = sand.u32 1, %s1094_s26   ;;  %s738_s20 = sshll.u32 %s1098_s27, 7 }
  0x41   : > { %s1423_s18 = scalar_select %p1245_p9, 1, 0 }
  0x42   : > { %s1251_s16 = sshll.u32 %s271_s19, 3  ;;  %s1256_s23 = scalar_lea.hbm %s1399_s0, %s738_s20 }
  0x43   : > { %s275_s29 = scalar_lea.vmem [#allocation2], %s1251_s16  ;;  %p1259_p11 = pnand %p833_p10, %p43_p13 }
  0x44   : > { %s282_s10 = sshll.u32 %s275_s29, 4  ;;  %s1266_s14 = scalar_lea.hbm %s1400_s1, %s738_s20  ;;  %s283_s10 = int_to_ptr.vmem [resolvable:$true] %s282_s10 }
  0x45   : > { %s272_s21 = scalar_lea.sflag [#allocation3], %s271_s19  ;;  %s966_s22 = scalar_lea.hbm %s1256_s23, 128 }
  0x46   : > { %p967_p1 = scmp.ne.s32.totalorder %s1256_s23, %s966_s22  ;;  %p968_p2 = pneg %p1259_p11 }
  0x47   : > { %s971_s3 = scalar_lea.hbm %s1399_s0, 256  ;;  %p972_p4 = scmp.lt.s32.totalorder %s1256_s23, %s1399_s0 }
  0x48   : > { %p969_p3 = pnand %p968_p2, %p967_p1  ;;  %p973_p6 = scmp.lt.s32.totalorder %s971_s3, %s966_s22 }
  0x4a   : > { %p970_p5 = pneg %p969_p3  ;;  %p974_p8 = por %p973_p6, %p972_p4 }
  0x4c   : > { %p975_p12 = pnand %p974_p8, %p970_p5 }
  0x4e   : > { %978 = shalt.err (!%p975_p12)
}
  0x4f   : > { %s979_s19 = scalar_lea.vmem %s283_s10, 128  ;;  %s1105_s20 = smov [#allocation2]  }
  0x50   : > { %p980_p7 = scmp.ne.s32.totalorder %s283_s10, %s979_s19  ;;  %s984_s12 = sshll.u32 %s1105_s20, 4  ;;  %s985_s12 = int_to_ptr.vmem [resolvable:$false] %s984_s12 }
  0x51   : > { %s986_s2 = scalar_lea.vmem %s985_s12, 256  ;;  %p987_p0 = scmp.lt.s32.totalorder %s283_s10, %s985_s12 }
  0x52   : > { %p982_p10 = pnand %p980_p7, %p968_p2  ;;  %p988_p1 = scmp.lt.s32.totalorder %s986_s2, %s979_s19 }
  0x54   : > { %p983_p13 = pneg %p982_p10  ;;  %p989_p3 = por %p988_p1, %p987_p0 }
  0x56   : > { %p990_p9 = pnand %p989_p3, %p983_p13 }
  0x58   : > { %993 = shalt.err (!%p990_p9)
}
  0x59   : > { %822 = dma.hbm_to_vmem [thread:$0]  (!%p1259_p11), %s1256_s23, 128, %s283_s10, %s272_s21  }
  0x5a   : > { %s289_s3 = sand.u32 1, %s1098_s27   ;;  %s293_s4 = scalar_lea.vmem [#allocation5], %s1251_s16 }
  0x5b   : > { %s300_s17 = sshll.u32 %s293_s4, 4  ;;  %s290_s15 = scalar_lea.sflag [#allocation6], %s289_s3  ;;  %s301_s17 = int_to_ptr.vmem [resolvable:$true] %s300_s17 }
  0x5c   : > { %s994_s22 = scalar_lea.hbm %s1266_s14, 128  ;;  %s999_s20 = scalar_lea.hbm %s1400_s1, 256 }
  0x5d   : > { %p995_p5 = scmp.ne.s32.totalorder %s1266_s14, %s994_s22  ;;  %p1000_p6 = scmp.lt.s32.totalorder %s1266_s14, %s1400_s1 }
  0x5e   : > { %p1001_p8 = scmp.lt.s32.totalorder %s999_s20, %s994_s22 }
  0x5f   : > { %p997_p9 = pnand %p995_p5, %p968_p2 }
  0x60   : > { %p1002_p12 = por %p1001_p8, %p1000_p6 }
  0x61   : > { %p998_p4 = pneg %p997_p9 }
  0x63   : > { %p1003_p7 = pnand %p1002_p12, %p998_p4 }
  0x65   : > { %1006 = shalt.err (!%p1003_p7)
}
  0x66   : > { %s1007_s16 = scalar_lea.vmem %s301_s17, 128  ;;  %s1106_s23 = smov [#allocation5]  }
  0x67   : > { %p1008_p10 = scmp.ne.s32.totalorder %s301_s17, %s1007_s16  ;;  %s1012_s10 = sshll.u32 %s1106_s23, 4  ;;  %s1013_s10 = int_to_ptr.vmem [resolvable:$false] %s1012_s10 }
  0x68   : > { %s1014_s21 = scalar_lea.vmem %s1013_s10, 256  ;;  %p1015_p1 = scmp.lt.s32.totalorder %s301_s17, %s1013_s10 }
  0x69   : > { %p1010_p13 = pnand %p1008_p10, %p968_p2  ;;  %p1016_p3 = scmp.lt.s32.totalorder %s1014_s21, %s1007_s16 }
  0x6b   : > { %p1011_p0 = pneg %p1010_p13  ;;  %p1017_p5 = por %p1016_p3, %p1015_p1 }
  0x6d   : > { %p1018_p9 = pnand %p1017_p5, %p1011_p0 }
  0x6f   : > { %1021 = shalt.err (!%p1018_p9)
}
  0x70   : > { %825 = dma.hbm_to_vmem [thread:$0]  (!%p1259_p11), %s1266_s14, 128, %s301_s17, %s290_s15  }
  0x71   : > { %p1425_p4 = scmp.ne.s32.totalorder %s1416_s9, 0 }
  0x72   : > { %s1311_s3 = sand.u32 (!%p1425_p4), 1, %s1090_s25   ;;  %p1426_p2 = scmp.ne.s32.totalorder (!%p1425_p4), %s1414_s30, 0 }
  0x73   : > { %309 = sbr.rel (%p1425_p4) target bundleno = 1619 (0x653), region = 48  ;;  %s1314_s4 = sshll.u32 (!%p1425_p4), %s1311_s3, 3 }
  0x74   : > { %s312_s22 = scalar_lea.sflag (!%p1425_p4), [#allocation3], %s1311_s3  ;;  %s315_s29 = scalar_lea.vmem (!%p1425_p4), [#allocation2], %s1314_s4 }
  0x78   : > { %1065 = dma.done.wait (%p1426_p2), %s312_s22, 128  }
  0x79   : > { %1067 = vsyncadd (%p1426_p2), %s312_s22, 4294967168  ;;  %s320_s9 = sand.u32 1, %s1172_s28   ;;  %s324_s14 = scalar_lea.vmem [#allocation5], %s1314_s4 }
  0x7a   : > { %s321_s11 = scalar_lea.sflag [#allocation6], %s320_s9 }
  0x7b   : > { %1069 = dma.done.wait (%p1426_p2), %s321_s11, 128  }
  0x7c   : > { %1071 = vsyncadd (%p1426_p2), %s321_s11, 4294967168  ;;  %p1427_p11 = scmp.eq.s32.totalorder %s1172_s28, 0 }
  0x7e   : > { %1073 = dma.done.wait (%p1427_p11), [#allocation6], 128   ;;  %p1428_p6 = pmov %p1427_p11 }
  0x80   : > { %1075 = vsyncadd (%p1428_p6), [#allocation6], 4294967168  ;;  %p1429_p8 = pmov %p1428_p6 }
  0x81   : > { %p1430_p12 = pmov %p1428_p6 }
  0x82   : > { %1077 = dma.done.wait (%p1429_p8), [#allocation9], 512  }
  0x83   : > { %1079 = vsyncadd (%p1430_p12), [#allocation9], 4294966784  ;;  %v1107_v0 = vmov 0.0   ;;  %vm1108_vm0 = vmmov 0   ;;  %v878_v1 = vld [vmem:[#allocation8 + $0x8] sm:$0xff]   ;;  %v879_v2 = vld [vmem:[#allocation8] sm:$0xff]  }
  0x84   : > { %769 = vmatprep.subr.bf16.mxu0 %v1107_v0  ;;  %773 = vmatprep.mubr.msk.bf16.mxu0 %vm1108_vm0, %v1107_v0  ;;  %v373_v3 = vld [vmem:[%s315_s29] sm:$0xff]  ;;  %vm391_vm1 = vcmask 261120   ;;  %v881_v6 = vld [vmem:[#allocation10] sm:$0xff]   ;;  %s1109_s30 = smov 96   ;;  %vm546_vm2 = vcmask 64512   ;;  %s758_s12 = sshll.u32 %s1172_s28, 7 }
  0x85   : > { %777 = vmatprep.subr.bf16.mxu1 %v1107_v0  ;;  %781 = vmatprep.mubr.msk.bf16.mxu1 %vm1108_vm0, %v1107_v0  ;;  %v880_v4 = vld [vmem:[#allocation10 + $0x8] sm:$0xff]   ;;  %v374_v5 = vpack.c.bf16 %v373_v3, %v373_v3  ;;  %v496_v19 = vld [vmem:[%s324_s14] sm:$0xff]  ;;  %s371_s2 = scalar_lea.vmem [#allocation11], %s1314_s4  ;;  %s608_s21 = scalar_lea.hbm %s1406_s7, %s758_s12 }
  0x86   : > { %770 = vmatpush3.bf16.msra.mxu0 %v878_v1  ;;  %778 = vmatpush3.bf16.msra.mxu1 %v880_v4  ;;  %v562_v36 = vld [vmem:[#allocation7] sm:$0xff]  ;;  %s610_s16 = sshll.u32 %s371_s2, 4  ;;  %s597_s22 = scalar_lea.sflag [#allocation4], %s1311_s3  ;;  %s611_s16 = int_to_ptr.vmem [resolvable:$true] %s610_s16 }
  0x87   : > { %771 = vmatprep.subr.bf16.mxu0 %v1107_v0  ;;  %779 = vmatprep.subr.bf16.mxu1 %v1107_v0  ;;  %v755_v49 = vld [vmem:[%s1404_s5] ss:$0 sm:$0xff]  ;;  %s1022_s29 = scalar_lea.vmem %s611_s16, 128  ;;  %p1431_p10 = scmp.ne.s32.totalorder %s1423_s18, 0 }
  0x88   : > { %v756_v51 = vld [vmem:[%s1405_s6] ss:$0 sm:$0xff]  ;;  %p1023_p7 = scmp.ne.s32.totalorder %s611_s16, %s1022_s29  ;;  %s1110_s9 = smov [#allocation11]  }
  0x89   : > { %s1026_s28 = sshll.u32 %s1110_s9, 4  ;;  %s1027_s28 = int_to_ptr.vmem [resolvable:$false] %s1026_s28 }
  0x8a   : > { %772 = vmatpush3.bf16.msra.mxu0 %v879_v2  ;;  %780 = vmatpush3.bf16.msra.mxu1 %v881_v6  ;;  %p1024_p13 = pnand %p1023_p7, %p1431_p10  ;;  %s1028_s4 = scalar_lea.vmem %s1027_s28, 256 }
  0x8b   : > { %785 = vmatprep.subr.bf16.mxu0 %v1107_v0  ;;  %p1029_p1 = scmp.lt.s32.totalorder %s611_s16, %s1027_s28  ;;  %p1030_p3 = scmp.lt.s32.totalorder %s1028_s4, %s1022_s29 }
  0x8c   : > { %p1025_p0 = pneg %p1024_p13 }
  0x8d   : > { %774 = vmatmul.mubr.msk.bf16.vlgmr.msra.gmra.mxu0 %vm391_vm1, %v374_v5  ;;  %p1031_p5 = por %p1030_p3, %p1029_p1 }
  0x8e   : > { %787 = vmatprep.mubr.msk.bf16.mxu0 %vm1108_vm0, %v1107_v0 }
  0x8f   : > { %p1032_p9 = pnand %p1031_p5, %p1025_p0 }
 0x14d   : > { %v1340_v7 = vpop.f32.mrf.mxu0 }
 0x14e   : > { %v435_v8 = vpack.c.bf16 %v1340_v7, %v1340_v7 }
 0x14f   : > { %v775_v9 = vpop.f32.mrf.mxu0 }
 0x150   : > { %782 = vmatmul.mubr.msk.bf16.vlgmr.msra.gmra.mxu1 %vm391_vm1, %v435_v8 }
 0x151   : > { %v432_v10 = vpop.f32.mrf.mxu0 }
 0x153   : > { %v776_v11 = vpop.f32.mrf.mxu0 }
 0x210   : > { %v489_v12 = vpop.f32.mrf.mxu1 }
 0x211   : > { %v495_v13 = vpack.c.bf16 %v489_v12, %v489_v12 }
 0x212   : > { %v783_v14 = vpop.f32.mrf.mxu1 }
 0x213   : > { %v504_v15 = vsel %vm391_vm1, %v495_v13, 0  ;;  %498 = vrot.lane.b32.xlu0 %v495_v13, %s1109_s30 }
 0x214   : > { %v492_v16 = vpop.f32.mrf.mxu1  ;;  %786 = vmatpush3.bf16.xpose.msra.mxu0 %v504_v15 }
 0x216   : > { %v784_v17 = vpop.f32.mrf.mxu1 }
 0x285   : > { %v499_v18 = vpop.permute.xlu0 %498 }
 0x286   : > { %788 = vmatmul.mubr.msk.bf16.vlgmr.msra.gmra.mxu0 %vm391_vm1, %v499_v18 }
 0x346   : > { %v540_v20 = vpop.f32.mrf.mxu0 }
 0x347   : > { %v541_v21 = vadd.f32 %v540_v20, %v496_v19 }
 0x348   : > { %v789_v22 = vpop.f32.mrf.mxu0 }
 0x349   : > { %v547_v23 = vsel %vm546_vm2, %v541_v21, -inf }
 0x34a   : > { %548 = vmax.xlane.f32.xlu0 %v547_v23  ;;  %v543_v24 = vpop.f32.mrf.mxu0 }
 0x34c   : > { %v790_v25 = vpop.f32.mrf.mxu0 }
 0x3d3   : > { %v549_v26 = vpop.xlane.xlu0 %548 }
 0x3d4   : > { %v550_v27 = vsub.f32 %v541_v21, %v549_v26 }
 0x3d6   : > { %v551_v28 = vmul.f32 1.442695, %v550_v27 }
 0x3d8   : > { %882 = vpow2.f32 %v551_v28 }
 0x3e5   : > { %v883_v29 = vpop.eup %882 }
 0x3e6   : > { %v553_v30 = vsel %vm546_vm2, %v883_v29, 0.0 }
 0x3e7   : > { %554 = vadd.xlane.f32.xlu1 %v553_v30 }
 0x470   : > { %v555_v31 = vpop.xlane.xlu1 %554 }
 0x471   : > { %884 = vrcp.f32 %v555_v31 }
 0x47e   : > { %v885_v32 = vpop.eup %884 }
 0x47f   : > { %v557_v33 = vmul.f32 %v885_v32, %v883_v29 }
 0x481   : > { %v558_v34 = vsel %vm546_vm2, %v557_v33, 0.0 }
 0x482   : > { %559 = vadd.xlane.f32.xlu1 %v558_v34 }
 0x50b   : > { %v560_v35 = vpop.xlane.xlu1 %559 }
 0x50c   : > { %v561_v37 = vmul.f32 %v560_v35, %v1340_v7 }
 0x50e   : > { %v563_v38 = vadd.f32 %v562_v36, %v561_v37 }
 0x510   : > { %v564_v39 = vsel %vm391_vm1, %v563_v38, 0.0 }
 0x511   : > { %565 = vadd.xlane.f32.xlu1 %v564_v39 }
 0x59a   : > { %v566_v40 = vpop.xlane.xlu1 %565 }
 0x59b   : > { %v568_v41 = vmul.f32 0.03125, %v566_v40 }
 0x59d   : > { %v569_v42 = vsub.f32 %v563_v38, %v568_v41 }
 0x59f   : > { %v570_v43 = vmul.f32 %v569_v42, %v569_v42 }
 0x5a1   : > { %v571_v44 = vsel %vm391_vm1, %v570_v43, 0.0 }
 0x5a2   : > { %572 = vadd.xlane.f32.xlu1 %v571_v44 }
 0x62b   : > { %v573_v45 = vpop.xlane.xlu1 %572 }
 0x62c   : > { %v574_v46 = vmul.f32 0.03125, %v573_v45 }
 0x62e   : > { %v575_v47 = vadd.f32 1e-05, %v574_v46 }
 0x630   : > { %886 = vrsqrt.f32 %v575_v47 }
 0x63d   : > { %v887_v48 = vpop.eup %886 }
 0x63e   : > { %v577_v50 = vmul.f32 %v887_v48, %v569_v42 }
 0x640   : > { %v585_v52 = vmul.f32 %v755_v49, %v577_v50 }
 0x642   : > { %v593_v53 = vadd.f32 %v756_v51, %v585_v52 }
 0x644   : > { %v594_v54 = vadd.f32 %v593_v53, %v1340_v7 }
 0x646   : > { %595 = vst.msk [vmem:[%s371_s2] sm:$0xff] %vm391_vm1, %v594_v54 }
 0x647   : > { %1035 = shalt.err (!%p1032_p9)
}
 0x648   : > { %s1036_s11 = scalar_lea.hbm %s608_s21, 128  ;;  %s1040_s30 = scalar_lea.hbm %s1406_s7, 256 }
 0x649   : > { %p1037_p4 = scmp.ne.s32.totalorder %s608_s21, %s1036_s11  ;;  %p1041_p6 = scmp.lt.s32.totalorder %s608_s21, %s1406_s7 }
 0x64a   : > { %p1042_p8 = scmp.lt.s32.totalorder %s1040_s30, %s1036_s11 }
 0x64b   : > { %p1038_p2 = pnand %p1037_p4, %p1431_p10 }
 0x64c   : > { %p1043_p12 = por %p1042_p8, %p1041_p6 }
 0x64d   : > { %p1039_p11 = pneg %p1038_p2 }
 0x64f   : > { %p1044_p7 = pnand %p1043_p12, %p1039_p11 }
 0x651   : > { %1047 = shalt.err (!%p1044_p7)
}
 0x652   : > { %807 = dma.vmem_to_hbm [thread:$0]  (%p1431_p10), %s611_s16, 128, %s608_s21, %s597_s22  }
 0x653 PF: > { %s622_s19 = sand.u32 1, %s1086_s24   ;;  %p1432_p13 = scmp.ne.s32.totalorder %s1415_s8, 0 }
 0x654   : > { %p1433_p0 = scmp.ge.s32.totalorder %s1098_s27, 2  ;;  %s623_s20 = scalar_lea.sflag [#allocation4], %s622_s19 }
 0x656   : > { %p827_p1 = pnand %p1433_p0, %p1432_p13 }
 0x658   : > { %p828_p3 = pneg %p827_p1 }
 0x65a   : > { %1081 = dma.done.wait (%p828_p3), %s623_s20, 128  }
 0x65b   : > { %1083 = vsyncadd (%p828_p3), %s623_s20, 4294967168  ;;  %s1434_s12 = sld [smem:[#allocation17_spill]]  ;;  %p24_p5 = scmp.ge.s32.totalorder %s1231_s13, 4  }
 0x65c   : > { %s1435_s24 = smov %s1090_s25  ;;  %s1436_s25 = smov %s1094_s26 }
 0x65d   : > { %s1438_s27 = smov %s1231_s13  ;;  %26 = sbr.rel (!%p24_p5) target bundleno = 12 (0xc), region = 118 }
 0x661   : > { %s1437_s26 = smov %s1434_s12 }
 0x662   :  { %628 = vsyncpa [#allocation3], 1 }
 0x663   :  { %630 = vsyncpa [#allocation3 + $0x1], 1 }
 0x664   :  { %631 = vsyncpa [#allocation6], 1 }
 0x665   :  { %633 = vsyncpa [#allocation6 + $0x1], 1 }
 0x666   :  { %634 = vsyncpa [#allocation9], 1 }
 0x667   :  { %635 = vsyncpa [#allocation4], 1 }
 0x668   :  { %637 = vsyncpa [#allocation4 + $0x1], 1 }

</bundles_post_ra>
